<compile_context>
chip_gen: v5e
topology: v5e:2x2
jax: 0.10.0
libtpu: 0.0.40
codegen_flags: <defaults>
</compile_context>

<pallas_src>
import numpy as np
import jax
import jax.numpy as jnp
from jax.experimental import pallas as pl
from jax.experimental.pallas import tpu as pltpu


_MAX_BLOCK_BYTES = 4 << 20  # per-step output block; ~8 MiB double-buffered,
                            # comfortably inside scoped VMEM on v5e/v6e/v7x.


def _rope_kernel(ids_ref, omega_ref, phase_ref, out_ref):
    # ids_ref:   (TN, n_terms) int/float positions (folded: G positions per row)
    # omega_ref: (n_terms, Wf) f32 per-term frequencies, exact zeros off-segment
    # phase_ref: (1, Wf)       f32 phases {0, +pi/2, -pi/2, 0} per 4-lane group
    # out_ref:   (TN, Wf)      f32 interleaved [[cos,-sin],[sin,cos]] entries
    ids_f = ids_ref[...].astype(jnp.float32)
    omega = omega_ref[...]
    n_terms = omega.shape[0]

    # angles[n, j] = pos(n, axis(j)) * omega_axis(j)[j//4]; all other terms are
    # exact zeros, so this stays an exact f32 product.  Keep it on the VPU —
    # do NOT move this contraction to jnp.dot/MXU (bf16 rounding).
    ang = ids_f[:, 0:1] * omega[0:1, :]
    for i in range(1, n_terms):                    # static & tiny -> unrolled
        ang = ang + ids_f[:, i:i + 1] * omega[i:i + 1, :]

    # cos(theta)        -> lanes 4k, 4k+3   (cos)
    # cos(theta + pi/2) -> lane  4k+1       (-sin)
    # cos(theta - pi/2) -> lane  4k+2       (+sin)
    ang = ang + phase_ref[...]
    out_ref[...] = jnp.cos(ang).astype(out_ref.dtype)


def _choose_seq_tile(n_rows, row_bytes):
    """Pick (seq_tile, padded_rows); tile is a multiple of 8 or the full extent."""
    if n_rows * row_bytes <= _MAX_BLOCK_BYTES:
        return n_rows, n_rows                       # single small block
    divisors = [t for t in range(8, n_rows, 8)
                if n_rows % t == 0 and t * row_bytes <= _MAX_BLOCK_BYTES]
    if divisors:
        # Prefer >= 8 grid steps along the sequence so both v7x TCs stay fed.
        wide = [t for t in divisors if n_rows // t >= 8]
        return (max(wide) if wide else max(divisors)), n_rows
    # Awkward n_rows (no 8-aligned divisor): pad rather than emitting one giant
    # unpipelined block that could overflow scoped VMEM on v7x.
    tile = max(8, (_MAX_BLOCK_BYTES // row_bytes) // 8 * 8)
    return tile, pl.cdiv(n_rows, tile) * tile


def rope_embedding(ids, *, axes_dim, theta, seq_tile=None):
    """ids: (B, N, n_axes) int/float positions -> (B, 1, N, sum(axes_dim)//2, 2, 2) f32."""
    B, N, n_axes = ids.shape
    assert len(axes_dim) == n_axes
    assert all(d % 2 == 0 for d in axes_dim), "every axes_dim entry must be even"
    d_half = sum(axes_dim) // 2
    W = 4 * d_half                                  # fused rotation-matrix lanes

    # Fold G consecutive positions into the lane dim when W < 128 so every
    # vreg / cos push / store is lane-dense (Flux: d_half=64 -> W=256 -> G=1).
    G = 1
    if W < 128 and 128 % W == 0 and N % (128 // W) == 0:
        G = 128 // W
    Wf = G * W
    n_terms = G * n_axes

    # ---- host-side constant tables (float64 like torch, cast to f32) --------
    # TODO(synk): torch builds omega/cos/sin in float64; TPU has no fast f64,
    # so only the tables are built in f64 and the trig runs in f32.  Positions
    # are cast to f32 in-kernel (exact for |pos| < 2^24, true for RoPE ids).
    omega4 = np.zeros((n_axes, W), dtype=np.float64)
    off = 0
    for i, d in enumerate(axes_dim):
        scale = np.arange(0, d, 2, dtype=np.float64) / d
        omega4[i, 4 * off:4 * (off + d // 2)] = np.repeat(1.0 / theta ** scale, 4)
        off += d // 2
    phase4 = np.tile(np.array([0.0, np.pi / 2, -np.pi / 2, 0.0]), d_half)  # (W,)
    omega_fold = np.zeros((n_terms, Wf), dtype=np.float64)
    for g in range(G):                               # block-diagonal replication
        omega_fold[g * n_axes:(g + 1) * n_axes, g * W:(g + 1) * W] = omega4
    omega_j = jnp.asarray(omega_fold, dtype=jnp.float32)
    phase_j = jnp.asarray(np.tile(phase4, G)[None, :], dtype=jnp.float32)

    # ---- fold + tile the sequence dimension ----------------------------------
    ids_fold = ids.reshape(B, N // G, n_terms)       # contiguous -> free
    n_rows = N // G
    row_bytes = Wf * 4
    if seq_tile is None:
        seq_tile, padded_rows = _choose_seq_tile(n_rows, row_bytes)
    else:
        assert n_rows % seq_tile == 0, "seq_tile must divide the (folded) sequence"
        padded_rows = n_rows
    if padded_rows != n_rows:
        # Rare path (N with no 8-aligned divisor); output slice below costs one
        # extra pass.  TODO(synk): pathological-N only; typical N never pads.
        ids_fold = jnp.pad(ids_fold, ((0, 0), (0, padded_rows - n_rows), (0, 0)))

    grid = (B, padded_rows // seq_tile)

    out = pl.pallas_call(
        _rope_kernel,
        out_shape=jax.ShapeDtypeStruct((B, padded_rows, Wf), jnp.float32),
        grid_spec=pltpu.PrefetchScalarGridSpec(
            num_scalar_prefetch=0,
            grid=grid,
            in_specs=[
                # positions for this (batch, seq-tile); leading batch squeezed
                pl.BlockSpec((None, seq_tile, n_terms), lambda b, s: (b, s, 0)),
                # tiny frequency / phase tables, resident across all grid steps
                pl.BlockSpec((n_terms, Wf), lambda b, s: (0, 0)),
                pl.BlockSpec((1, Wf), lambda b, s: (0, 0)),
            ],
            out_specs=pl.BlockSpec((None, seq_tile, Wf), lambda b, s: (b, s, 0)),
        ),
        compiler_params=pltpu.CompilerParams(
            dimension_semantics=("parallel", "parallel")),
        cost_estimate=pl.CostEstimate(
            flops=int(B * padded_rows * Wf * (2 * n_terms + 1)),
            transcendentals=int(B * padded_rows * Wf),
            bytes_accessed=int(ids_fold.size * ids_fold.dtype.itemsize
                               + (n_terms + 1) * Wf * 4
                               + B * padded_rows * Wf * 4)),
    )(ids_fold, omega_j, phase_j)

    if padded_rows != n_rows:
        out = out[:, :n_rows]
    # Free contiguous reshapes: (B, N//G, G*W) -> (B, N, W) -> (B, N, d_half, 2, 2).
    emb = out.reshape(B, N, d_half, 2, 2)
    return emb[:, None]                              # (B, 1, N, d_half, 2, 2)


# ----------------------------- pure-JAX reference -----------------------------

def _rope_ref_single(pos, dim, theta):
    scale = np.arange(0, dim, 2, dtype=np.float64) / dim
    omega = jnp.asarray(1.0 / (theta ** scale), dtype=jnp.float32)   # (dim//2,)
    out = pos.astype(jnp.float32)[..., None] * omega                 # (B, N, dim//2)
    cos_o, sin_o = jnp.cos(out), jnp.sin(out)
    stacked = jnp.stack([cos_o, -sin_o, sin_o, cos_o], axis=-1)      # (B, N, dim//2, 4)
    b, n = pos.shape
    return stacked.reshape(b, n, dim // 2, 2, 2)


def _reference(ids, axes_dim, theta):
    n_axes = ids.shape[-1]
    emb = jnp.concatenate(
        [_rope_ref_single(ids[..., i], axes_dim[i], theta) for i in range(n_axes)],
        axis=-3)
    return emb[:, None]


if __name__ == "__main__":
    theta = 10000
    axes_dim = (8, 8, 16)            # sum = 32 -> d_half = 16, W = 64 (G = 2)
    B, N = 2, 32

    key = jax.random.PRNGKey(0)
    ids = jax.random.randint(key, (B, N, len(axes_dim)), 0, 64)      # int32

    ref = _reference(ids, axes_dim, theta)

    # default tiling path
    out = jax.block_until_ready(rope_embedding(ids, axes_dim=axes_dim, theta=theta))
    assert out.shape == (B, 1, N, sum(axes_dim) // 2, 2, 2)
    assert jnp.allclose(out, ref, atol=1e-4, rtol=1e-4), "mismatch (default tiling)"

    # explicit multi-step grid path
    out2 = jax.block_until_ready(
        rope_embedding(ids, axes_dim=axes_dim, theta=theta, seq_tile=8))
    assert jnp.allclose(out2, ref, atol=1e-4, rtol=1e-4), "mismatch (seq_tile=8)"

    print("KERNEL_OK")
</pallas_src>

<mosaic_0001>
module attributes {stable_mosaic.version = 11 : i64} {
  func.func @_rope_kernel(%arg0: i32, %arg1: i32, %arg2: memref<1x16x6xi32, #tpu.memory_space<vmem>>, %arg3: memref<6x128xf32, #tpu.memory_space<vmem>>, %arg4: memref<1x128xf32, #tpu.memory_space<vmem>>, %arg5: memref<1x16x128xf32, #tpu.memory_space<vmem>>) attributes {dimension_semantics = [#tpu.dimension_semantics<parallel>, #tpu.dimension_semantics<parallel>], iteration_bounds = array<i64: 2, 1>, scalar_prefetch = 0 : i64, scratch_operands = 0 : i64, tpu.core_type = #tpu.core_type<tc>, window_params = [{transform_indices = @transform_0, window_bounds = array<i64: 1, 16, 6>}, {pipeline_mode = #tpu.pipeline_mode<synchronous>, transform_indices = @transform_1, window_bounds = array<i64: 6, 128>}, {pipeline_mode = #tpu.pipeline_mode<synchronous>, transform_indices = @transform_2, window_bounds = array<i64: 1, 128>}, {transform_indices = @transform_3, window_bounds = array<i64: 1, 16, 128>}]} {
    %c0 = arith.constant 0 : index
    %c0_0 = arith.constant 0 : index
    %c0_1 = arith.constant 0 : index
    %0 = vector.load %arg2[%c0, %c0_0, %c0_1] : memref<1x16x6xi32, #tpu.memory_space<vmem>>, vector<1x16x6xi32>
    %1 = vector.shape_cast %0 : vector<1x16x6xi32> to vector<16x6xi32>
    %2 = arith.sitofp %1 : vector<16x6xi32> to vector<16x6xf32>
    %c0_2 = arith.constant 0 : index
    %c0_3 = arith.constant 0 : index
    %3 = vector.load %arg3[%c0_2, %c0_3] : memref<6x128xf32, #tpu.memory_space<vmem>>, vector<6x128xf32>
    %4 = vector.extract_strided_slice %2 {offsets = [0, 0], sizes = [16, 1], strides = [1, 1]} : vector<16x6xf32> to vector<16x1xf32>
    %5 = vector.extract_strided_slice %3 {offsets = [0, 0], sizes = [1, 128], strides = [1, 1]} : vector<6x128xf32> to vector<1x128xf32>
    %6 = vector.broadcast %4 : vector<16x1xf32> to vector<16x128xf32>
    %7 = vector.broadcast %5 : vector<1x128xf32> to vector<16x128xf32>
    %8 = arith.mulf %6, %7 : vector<16x128xf32>
    %9 = vector.extract_strided_slice %2 {offsets = [0, 1], sizes = [16, 1], strides = [1, 1]} : vector<16x6xf32> to vector<16x1xf32>
    %10 = vector.extract_strided_slice %3 {offsets = [1, 0], sizes = [1, 128], strides = [1, 1]} : vector<6x128xf32> to vector<1x128xf32>
    %11 = vector.broadcast %9 : vector<16x1xf32> to vector<16x128xf32>
    %12 = vector.broadcast %10 : vector<1x128xf32> to vector<16x128xf32>
    %13 = arith.mulf %11, %12 : vector<16x128xf32>
    %14 = arith.addf %8, %13 : vector<16x128xf32>
    %15 = vector.extract_strided_slice %2 {offsets = [0, 2], sizes = [16, 1], strides = [1, 1]} : vector<16x6xf32> to vector<16x1xf32>
    %16 = vector.extract_strided_slice %3 {offsets = [2, 0], sizes = [1, 128], strides = [1, 1]} : vector<6x128xf32> to vector<1x128xf32>
    %17 = vector.broadcast %15 : vector<16x1xf32> to vector<16x128xf32>
    %18 = vector.broadcast %16 : vector<1x128xf32> to vector<16x128xf32>
    %19 = arith.mulf %17, %18 : vector<16x128xf32>
    %20 = arith.addf %14, %19 : vector<16x128xf32>
    %21 = vector.extract_strided_slice %2 {offsets = [0, 3], sizes = [16, 1], strides = [1, 1]} : vector<16x6xf32> to vector<16x1xf32>
    %22 = vector.extract_strided_slice %3 {offsets = [3, 0], sizes = [1, 128], strides = [1, 1]} : vector<6x128xf32> to vector<1x128xf32>
    %23 = vector.broadcast %21 : vector<16x1xf32> to vector<16x128xf32>
    %24 = vector.broadcast %22 : vector<1x128xf32> to vector<16x128xf32>
    %25 = arith.mulf %23, %24 : vector<16x128xf32>
    %26 = arith.addf %20, %25 : vector<16x128xf32>
    %27 = vector.extract_strided_slice %2 {offsets = [0, 4], sizes = [16, 1], strides = [1, 1]} : vector<16x6xf32> to vector<16x1xf32>
    %28 = vector.extract_strided_slice %3 {offsets = [4, 0], sizes = [1, 128], strides = [1, 1]} : vector<6x128xf32> to vector<1x128xf32>
    %29 = vector.broadcast %27 : vector<16x1xf32> to vector<16x128xf32>
    %30 = vector.broadcast %28 : vector<1x128xf32> to vector<16x128xf32>
    %31 = arith.mulf %29, %30 : vector<16x128xf32>
    %32 = arith.addf %26, %31 : vector<16x128xf32>
    %33 = vector.extract_strided_slice %2 {offsets = [0, 5], sizes = [16, 1], strides = [1, 1]} : vector<16x6xf32> to vector<16x1xf32>
    %34 = vector.extract_strided_slice %3 {offsets = [5, 0], sizes = [1, 128], strides = [1, 1]} : vector<6x128xf32> to vector<1x128xf32>
    %35 = vector.broadcast %33 : vector<16x1xf32> to vector<16x128xf32>
    %36 = vector.broadcast %34 : vector<1x128xf32> to vector<16x128xf32>
    %37 = arith.mulf %35, %36 : vector<16x128xf32>
    %38 = arith.addf %32, %37 : vector<16x128xf32>
    %c0_4 = arith.constant 0 : index
    %c0_5 = arith.constant 0 : index
    %39 = vector.load %arg4[%c0_4, %c0_5] : memref<1x128xf32, #tpu.memory_space<vmem>>, vector<1x128xf32>
    %40 = vector.broadcast %39 : vector<1x128xf32> to vector<16x128xf32>
    %41 = arith.addf %38, %40 : vector<16x128xf32>
    %42 = math.cos %41 : vector<16x128xf32>
    %c0_6 = arith.constant 0 : index
    %c0_7 = arith.constant 0 : index
    %c0_8 = arith.constant 0 : index
    %43 = vector.load %arg5[%c0_6, %c0_7, %c0_8] : memref<1x16x128xf32, #tpu.memory_space<vmem>>, vector<1x16x128xf32>
    %44 = vector.shape_cast %43 : vector<1x16x128xf32> to vector<16x128xf32>
    %45 = vector.shape_cast %42 : vector<16x128xf32> to vector<1x16x128xf32>
    tpu.vector_store %arg5[%c0_6, %c0_7, %c0_8], %45 {strides = array<i32>} : memref<1x16x128xf32, #tpu.memory_space<vmem>>, vector<1x16x128xf32>,
    return
  }
  func.func @transform_0(%arg0: i32, %arg1: i32) -> (i32, i32, i32) {
    %c0_i32 = arith.constant 0 : i32
    %c0_i32_0 = arith.constant 0 : i32
    return %arg0, %arg1, %c0_i32 : i32, i32, i32
  }
  func.func @transform_1(%arg0: i32, %arg1: i32) -> (i32, i32) {
    %c0_i32 = arith.constant 0 : i32
    %c0_i32_0 = arith.constant 0 : i32
    %c0_i32_1 = arith.constant 0 : i32
    return %c0_i32, %c0_i32_0 : i32, i32
  }
  func.func @transform_2(%arg0: i32, %arg1: i32) -> (i32, i32) {
    %c0_i32 = arith.constant 0 : i32
    %c0_i32_0 = arith.constant 0 : i32
    %c0_i32_1 = arith.constant 0 : i32
    return %c0_i32, %c0_i32_0 : i32, i32
  }
  func.func @transform_3(%arg0: i32, %arg1: i32) -> (i32, i32, i32) {
    %c0_i32 = arith.constant 0 : i32
    %c0_i32_0 = arith.constant 0 : i32
    return %arg0, %arg1, %c0_i32 : i32, i32, i32
  }
}

</mosaic_0001>

<bundles_post_ra>
// kernel: tpu_custom_call.1
= control target key start
LH: loop header
LB: loop body
LE: loop exit
PB: predicated region body
PF: predicated region fallthrough
CT: control target
= control target key end

     0   :  { %8 = vsyncpa [#allocation3], 0  ;;  %s1183_s0 = inlined_call_operand.vmem [shape: s32[2,16,6], index: 0, kind: input, shape index: {}]   ;;  %s1184_s1 = inlined_call_operand.vmem [shape: f32[6,128], index: 1, kind: input, shape index: {}]   ;;  %s1185_s2 = inlined_call_operand.vmem [shape: f32[1,128], index: 2, kind: input, shape index: {}]   ;;  %s1186_s3 = inlined_call_operand.hbm [shape: f32[2,16,128], index: 3, kind: output, shape index: {}]  }
   0x1   :  { %10 = vsyncpa [#allocation3 + $0x1], 0  ;;  %s910_s12 = smov 0   ;;  %s912_s13 = smov 0  }
   0x2   :  { %s914_s14 = smov 0   ;;  %s916_s15 = smov 0  }
   0x3   :  { %s918_s16 = smov 0   ;;  %s920_s17 = smov 0  }
   0x4 LB: > { %s696_s18 = sadd.s32 4294967295, %s874_s17   ;;  %s697_s19 = sadd.s32 4294967294, %s874_s17   ;;  %s874_s17 = sphi %s920_s17, %s16_s17   ;;  %s870_s16 = sphi %s918_s16, %s1197_s16   ;;  %s866_s15 = sphi %s916_s15, %s1196_s15   ;;  %s862_s14 = sphi %s914_s14, %s1195_s14   ;;  %s858_s13 = sphi %s912_s13, %s1194_s13   ;;  %s854_s12 = sphi %s910_s12, %s1193_s12  }
   0x5   : > { %s28_s20 = sadd.s32 1, %s870_s16  ;;  %s107_s21 = sadd.s32 1, %s862_s14 }
   0x6   : > { %p30_p0 = scmp.ge.s32.totalorder %s28_s20, 2  ;;  %p117_p1 = scmp.ne.s32.totalorder %s862_s14, %s858_s13 }
   0x7   : > { %p118_p2 = scmp.eq.s32.totalorder %s696_s18, 1  ;;  %p123_p3 = scmp.ne.s32.totalorder %s858_s13, %s854_s12 }
   0x8   : > { %s1199_s20 = smov (%p30_p0, %s28_s20), 0  ;;  %p124_p5 = scmp.eq.s32.totalorder %s697_s19, 1 }
   0x9   : > { %p950_p4 = por %p118_p2, %p117_p1  ;;  %s102_s23 = ssub.s32 %s870_s16, %s1199_s20 }
   0xa   : > { %p700_p6 = scmp.ge.s32.totalorder %s874_s17, 1  ;;  %p105_p7 = scmp.eq.s32.totalorder %s102_s23, 0 }
   0xb   : > { %p957_p8 = por %p124_p5, %p123_p3  ;;  %p161_p9 = scmp.lt.s32.totalorder %s874_s17, 3 }
   0xc   : > { %s963_s25 = scalar_select %p105_p7, %s862_s14, %s107_s21  }
   0xd   : > { %p162_p10 = pnand %p700_p6, %p161_p9 }
   0xe   : > { %p190_p11 = scmp.lt.s32.totalorder (!%p162_p10), %s866_s15, 1  ;;  %s186_s8 = sand.u32 (!%p162_p10), 1, %s858_s13  }
   0xf   : > { %165 = sbr.rel (%p162_p10) target bundleno = 288 (0x120), region = 32  ;;  %s701_s9 = sshll.u32 (!%p162_p10), %s186_s8, 4 }
  0x10   : > { %s1133_s10 = scalar_lea.vmem (!%p162_p10), [#allocation2], %s701_s9  ;;  %s716_s11 = sshll.u32 (!%p162_p10), %s866_s15, 4 }
  0x11   : > { %s613_s21 = scalar_lea.hbm (!%p162_p10), %s1186_s3, %s716_s11  ;;  %s614_s23 = sshll.u32 (!%p162_p10), %s1133_s10, 4  ;;  %s615_s23 = int_to_ptr.vmem [resolvable:$true] %s614_s23 }
  0x12   : > { %s816_s4 = scalar_lea.hbm (!%p162_p10), %s1186_s3, 32 }
  0x14   : > { %v876_v0 = vmov 1   ;;  %v877_v1 = vmov 0   ;;  %s191_s26 = scalar_select %p190_p11, %s866_s15, 1  ;;  %v878_v2 = vmov 2   ;;  %v879_v7 = vmov 3  }
  0x15   : > { %787 = vset.pattern.permute.xlu1 %v876_v0  ;;  %786 = vset.pattern.permute.xlu0 %v877_v1  ;;  %v880_v8 = vmov 4   ;;  %v881_v9 = vmov 5   ;;  %v204_v14 = vld [vmem:[%s1184_s1] sm:$0x3f]  ;;  %s600_s15 = scalar_lea.sflag [#allocation3], %s186_s8 }
  0x16   : > { %788 = vset.pattern.permute.xlu2 %v878_v2  ;;  %s715_s27 = sshll.u32 %s191_s26, 4  ;;  %v226_v15 = vperm.slane %v204_v14, 1  ;;  %v215_v16 = vperm.slane %v204_v14, 0  ;;  %v239_v20 = vperm.slane %v204_v14, 2  ;;  %v265_v25 = vperm.slane %v204_v14, 4  ;;  %s616_s26 = sshll.u32 %s613_s21, 4  ;;  %s617_s26 = int_to_ptr.hbm [resolvable:$true] %s616_s26 }
  0x17   : > { %s197_s30 = scalar_lea.vmem %s1183_s0, %s715_s27  ;;  %v252_v26 = vperm.slane %v204_v14, 3  ;;  %v278_v27 = vperm.slane %v204_v14, 5  ;;  %v795_v39 = vld [vmem:[%s1185_s2] ss:$0 sm:$0xff]  ;;  %s810_s27 = sshra.s32 %s617_s26, 4  ;;  %s811_s27 = int_to_ptr.hbm [resolvable:$true] %s810_s27 }
  0x18   : > { %v200_v3 = vld [vmem:[%s197_s30] sm:$0xff]  ;;  %v201_v5 = vld [vmem:[%s197_s30 + $0x8] sm:$0xff]  ;;  %s812_s28 = scalar_lea.hbm %s811_s27, 16  ;;  %p817_p1 = scmp.lt.s32.totalorder %s811_s27, %s1186_s3 }
  0x19   : > { %v202_v4 = vcvt.s32.f32 %v200_v3  ;;  %v203_v6 = vcvt.s32.f32 %v201_v5  ;;  %p813_p12 = scmp.ne.s32.totalorder %s811_s27, %s812_s28  ;;  %p818_p2 = scmp.lt.s32.totalorder %s816_s4, %s812_s28 }
  0x1b   : > { %219 = vperm.xlu1 %787, %v202_v4   ;;  %207 = vperm.xlu0 %786, %v202_v4   ;;  %p814_p13 = pnand %p813_p12, %p950_p4  ;;  %p819_p3 = por %p818_p2, %p817_p1 }
  0x1c   : > { %232 = vperm.xlu2 %788, %v202_v4  }
  0x1d   : > { %p815_p0 = pneg %p814_p13 }
  0x1f   : > { %p820_p5 = pnand %p819_p3, %p815_p0 }
  0x23   : > { %223 = vperm.xlu1 %787, %v203_v6   ;;  %212 = vperm.xlu0 %786, %v203_v6  }
  0x24   : > { %236 = vperm.xlu2 %788, %v203_v6  }
  0x2b   : > { %790 = vset.pattern.permute.xlu1 %v879_v7  ;;  %789 = vset.pattern.permute.xlu0 %v879_v7 }
  0x2c   : > { %249 = vperm.xlu1 %790, %v203_v6   ;;  %245 = vperm.xlu0 %789, %v202_v4  }
  0x2d   : > { %791 = vset.pattern.permute.xlu2 %v880_v8 }
  0x2e   : > { %258 = vperm.xlu2 %791, %v202_v4  }
  0x34   : > { %792 = vset.pattern.permute.xlu1 %v880_v8  ;;  %794 = vset.pattern.permute.xlu0 %v881_v9 }
  0x35   : > { %262 = vperm.xlu1 %792, %v203_v6   ;;  %275 = vperm.xlu0 %794, %v203_v6  }
  0x36   : > { %793 = vset.pattern.permute.xlu2 %v881_v9  ;;  %v882_v9 = vmov 683565275  }
  0x37   : > { %271 = vperm.xlu2 %793, %v202_v4  }
  0x76   : > { %v233_v10 = vpop.permute.xlu2 %232 }
  0x77   : > { %v240_v23 = vmul.f32 %v239_v20, %v233_v10 }
  0x7e   : > { %v237_v11 = vpop.permute.xlu2 %236 }
  0x7f   : > { %v241_v41 = vmul.f32 %v239_v20, %v237_v11  ;;  %v883_v11 = vmov 2475754826  }
  0x88   : > { %v259_v17 = vpop.permute.xlu2 %258 }
  0x89   : > { %v266_v33 = vmul.f32 %v265_v25, %v259_v17 }
  0x8d   : > { %v220_v12 = vpop.permute.xlu1 %219  ;;  %v208_v13 = vpop.permute.xlu0 %207 }
  0x8e   : > { %v227_v21 = vmul.f32 %v226_v15, %v220_v12  ;;  %v216_v22 = vmul.f32 %v215_v16, %v208_v13  ;;  %v884_v13 = vmov 2131351028  }
  0x90   : > { %v229_v24 = vadd.f32 %v227_v21, %v216_v22  ;;  %v886_v21 = vmov 920167782  }
  0x91   : > { %v272_v28 = vpop.permute.xlu2 %271 }
  0x92   : > { %v242_v34 = vadd.f32 %v240_v23, %v229_v24  ;;  %v279_v37 = vmul.f32 %v278_v27, %v272_v28  ;;  %v887_v24 = vmov 1326507024  }
  0x95   : > { %v224_v18 = vpop.permute.xlu1 %223  ;;  %v213_v19 = vpop.permute.xlu0 %212 }
  0x96   : > { %v228_v29 = vmul.f32 %v226_v15, %v224_v18  ;;  %v217_v30 = vmul.f32 %v215_v16, %v213_v19  ;;  %v885_v18 = vmov 2102212464  }
  0x98   : > { %v230_v38 = vadd.f32 %v228_v29, %v217_v30 }
  0x9a   : > { %v243_v44 = vadd.f32 %v241_v41, %v230_v38 }
  0x9e   : > { %v250_v31 = vpop.permute.xlu1 %249  ;;  %v246_v32 = vpop.permute.xlu0 %245 }
  0x9f   : > { %v253_v35 = vmul.f32 %v252_v26, %v246_v32  ;;  %v254_v42 = vmul.f32 %v252_v26, %v250_v31 }
  0xa1   : > { %v255_v36 = vadd.f32 %v253_v35, %v242_v34  ;;  %v256_v48 = vadd.f32 %v254_v42, %v243_v44 }
  0xa3   : > { %v268_v40 = vadd.f32 %v266_v33, %v255_v36 }
  0xa5   : > { %v281_v43 = vadd.f32 %v279_v37, %v268_v40 }
  0xa7   : > { %v977_v45 = vadd.f32 %v795_v39, %v281_v43  ;;  %v263_v46 = vpop.permute.xlu1 %262  ;;  %v276_v47 = vpop.permute.xlu0 %275 }
  0xa8   : > { %v267_v49 = vmul.f32 %v265_v25, %v263_v46  ;;  %v280_v50 = vmul.f32 %v278_v27, %v276_v47 }
  0xa9   : > { %v289_v51 = vand.u32 2147483647, %v977_v45  ;;  %v292_v52 = vand.u32 2139095040, %v977_v45 }
  0xaa   : > { %v269_v53 = vadd.f32 %v267_v49, %v256_v48 }
  0xab   : > { %v293_v54 = vshrl.u32 %v292_v52, 23  ;;  %v296_v55 = vand.u32 8388607, %v289_v51 }
  0xac   : > { %v282_v56 = vadd.f32 %v280_v50, %v269_v53 }
  0xad   : > { %v704_v57 = vadd.s32 4294967169, %v293_v54  ;;  %v297_v58 = vor.u32 8388608, %v296_v55 }
  0xae   : > { %v983_v59 = vadd.f32 %v795_v39, %v282_v56 }
  0xaf   : > { %v299_v60 = vadd.s32 1, %v704_v57  ;;  %v987_v63 = vshll.u32 %v297_v58, 8 }
  0xb0   : > { %v443_v61 = vand.u32 2147483647, %v983_v59  ;;  %v446_v62 = vand.u32 2139095040, %v983_v59 }
  0xb1   : > { %vm300_vm0 = vcmp.gt.s32.totalorder %v299_v60, 0  ;;  %v338_v7 = vand.u32 65535, %v987_v63  ;;  %v339_v44 = vshrl.u32 %v987_v63, 16 }
  0xb2   : > { %v301_v0 = vsel %vm300_vm0, %v299_v60, 0  ;;  %v447_v2 = vshrl.u32 %v446_v62, 23  ;;  %v450_v3 = vand.u32 8388607, %v443_v61 }
  0xb3   : > { %v303_v4 = vand.u32 31, %v301_v0  ;;  %v302_v5 = vshrl.u32 %v301_v0, 5 }
  0xb4   : > { %v707_v8 = vadd.s32 4294967169, %v447_v2  ;;  %v451_v15 = vor.u32 8388608, %v450_v3 }
  0xb5   : > { %v304_v6 = vsub.s32 32, %v303_v4  ;;  %v306_v10 = vshll.u32 %v882_v9, %v303_v4  ;;  %v309_v12 = vshll.u32 %v883_v11, %v303_v4  ;;  %v312_v14 = vshll.u32 %v884_v13, %v303_v4 }
  0xb6   : > { %v315_v20 = vshll.u32 %v885_v18, %v303_v4  ;;  %v318_v23 = vshll.u32 %v886_v21, %v303_v4  ;;  %vm321_vm1 = vcmp.lt.s32.totalorder %v302_v5, 1  ;;  %v453_v29 = vadd.s32 1, %v707_v8 }
  0xb7   : > { %v307_v16 = vshrl.u32 %v883_v11, %v304_v6  ;;  %v310_v17 = vshrl.u32 %v884_v13, %v304_v6  ;;  %v313_v19 = vshrl.u32 %v885_v18, %v304_v6  ;;  %v316_v22 = vshrl.u32 %v886_v21, %v304_v6 }
  0xb8   : > { %v319_v25 = vshrl.u32 %v887_v24, %v304_v6  ;;  %vm322_vm2 = vcmp.lt.s32.totalorder %v302_v5, 2  ;;  %vm324_vm3 = vcmp.lt.s32.totalorder %v302_v5, 4  ;;  %v305_v32 = vshrl.u32 %v882_v9, %v304_v6 }
  0xb9   : > { %v308_v26 = vor.u32 %v307_v16, %v306_v10  ;;  %v311_v27 = vor.u32 %v310_v17, %v309_v12  ;;  %v314_v28 = vor.u32 %v313_v19, %v312_v14  ;;  %v317_v30 = vor.u32 %v316_v22, %v315_v20 }
  0xba   : > { %v320_v31 = vor.u32 %v319_v25, %v318_v23  ;;  %vm323_vm4 = vcmp.lt.s32.totalorder %v302_v5, 3  ;;  %vm454_vm5 = vcmp.gt.s32.totalorder %v453_v29, 0  ;;  %v1012_v53 = vshll.u32 %v451_v15, 8 }
  0xbb   : > { %v326_v33 = vsel %vm324_vm3, %v314_v28, 2102212464  ;;  %v329_v34 = vsel %vm321_vm1, %v308_v26, %v311_v27  ;;  %v333_v35 = vsel %vm321_vm1, %v311_v27, %v314_v28  ;;  %v330_v36 = vsel %vm324_vm3, %v317_v30, 920167782 }
  0xbc   : > { %v334_v37 = vsel %vm324_vm3, %v320_v31, 1326507024  ;;  %v325_v38 = vsel %vm321_vm1, %v305_v32, %v308_v26  ;;  %v327_v39 = vsel %vm323_vm4, %v311_v27, %v326_v33  ;;  %v331_v40 = vsel %vm323_vm4, %v314_v28, %v330_v36 }
  0xbd   : > { %v335_v41 = vsel %vm323_vm4, %v317_v30, %v334_v37  ;;  %v332_v42 = vsel %vm322_vm2, %v329_v34, %v331_v40  ;;  %v455_v46 = vsel %vm454_vm5, %v453_v29, 0  ;;  %v1010_v52 = vsel %vm322_vm2, %v325_v38, %v327_v39 }
  0xbe   : > { %v336_v43 = vsel %vm322_vm2, %v333_v35, %v335_v41  ;;  %v362_v49 = vand.u32 65535, %v332_v42  ;;  %v363_v50 = vshrl.u32 %v332_v42, 16  ;;  %v1014_v56 = vshrl.u32 %v455_v46, 5 }
  0xbf   : > { %v340_v47 = vand.u32 65535, %v336_v43  ;;  %v341_v48 = vshrl.u32 %v336_v43, 16  ;;  %v457_v57 = vand.u32 31, %v455_v46 }
  0xc0   : > { %v365_v62 = vmul.u32 %v363_v50, %v338_v7  ;;  %v366_v0 = vmul.u32 %v362_v49, %v339_v44  ;;  %v364_v4 = vmul.u32 %v362_v49, %v338_v7  ;;  %v367_v6 = vmul.u32 %v363_v50, %v339_v44 }
  0xc1   : > { %v343_v54 = vmul.u32 %v341_v48, %v338_v7  ;;  %v344_v55 = vmul.u32 %v340_v47, %v339_v44  ;;  %v342_v58 = vmul.u32 %v340_v47, %v338_v7  ;;  %v345_v60 = vmul.u32 %v341_v48, %v339_v44 }
  0xc2   : > { %v368_v5 = vshll.u32 %v365_v62, 16  ;;  %v369_v12 = vshrl.u32 %v365_v62, 16  ;;  %v370_v15 = vshll.u32 %v366_v0, 16  ;;  %v1016_v16 = vsub.s32 32, %v457_v57 }
  0xc3   : > { %v346_v2 = vshll.u32 %v343_v54, 16  ;;  %v347_v3 = vshrl.u32 %v343_v54, 16  ;;  %v348_v8 = vshll.u32 %v344_v55, 16  ;;  %v349_v10 = vshrl.u32 %v344_v55, 16 }
  0xc4   : > { %v371_v19 = vshrl.u32 %v366_v0, 16  ;;  %vm372_vm7 = vc.u32 %v364_v4, %v368_v5  ;;  %v374_v20 = vadd.s32 %v368_v5, %v364_v4  ;;  %v460_v7 = vshll.u32 %v882_v9, %v457_v57 }
  0xc5   : > { %vm350_vm6 = vc.u32 %v342_v58, %v346_v2  ;;  %v352_v14 = vadd.s32 %v346_v2, %v342_v58  ;;  %v373_v23 = vsel %vm372_vm7, 1, %v877_v1  ;;  %v463_v27 = vshll.u32 %v883_v11, %v457_v57 }
  0xc6   : > { %v351_v17 = vsel %vm350_vm6, 1, %v877_v1  ;;  %v375_v26 = vadd.s32 %v373_v23, %v367_v6  ;;  %vm376_vm9 = vc.u32 %v374_v20, %v370_v15  ;;  %v461_v30 = vshrl.u32 %v883_v11, %v1016_v16 }
  0xc7   : > { %v353_v22 = vadd.s32 %v351_v17, %v345_v60  ;;  %vm354_vm8 = vc.u32 %v352_v14, %v348_v8  ;;  %v377_v29 = vsel %vm376_vm9, 1, %v877_v1  ;;  %v464_v31 = vshrl.u32 %v884_v13, %v1016_v16 }
  0xc8   : > { %v355_v25 = vsel %vm354_vm8, 1, %v877_v1  ;;  %v379_v32 = vadd.s32 %v377_v29, %v375_v26  ;;  %v466_v33 = vshll.u32 %v884_v13, %v457_v57  ;;  %v467_v34 = vshrl.u32 %v885_v18, %v1016_v16 }
  0xc9   : > { %v357_v28 = vadd.s32 %v355_v25, %v353_v22  ;;  %v469_v35 = vshll.u32 %v885_v18, %v457_v57  ;;  %v1032_v37 = vor.u32 %v461_v30, %v460_v7  ;;  %v1034_v38 = vor.u32 %v464_v31, %v463_v27 }
  0xca   : > { %v470_v39 = vshrl.u32 %v886_v21, %v1016_v16  ;;  %v380_v11 = vadd.s32 %v379_v32, %v369_v12  ;;  %v468_v40 = vor.u32 %v467_v34, %v466_v33  ;;  %v472_v41 = vshll.u32 %v886_v21, %v457_v57 }
  0xcb   : > { %v358_v36 = vadd.s32 %v357_v28, %v347_v3  ;;  %v473_v13 = vshrl.u32 %v887_v24, %v1016_v16  ;;  %v1043_v43 = vadd.s32 %v374_v20, %v370_v15  ;;  %vm475_vm10 = vcmp.lt.s32.totalorder %v1014_v56, 1 }
  0xcc   : > { %v471_v18 = vor.u32 %v470_v39, %v469_v35  ;;  %v381_v44 = vadd.s32 %v380_v11, %v371_v19  ;;  %vm478_vm11 = vcmp.lt.s32.totalorder %v1014_v56, 4  ;;  %v483_v47 = vsel %vm475_vm10, %v1032_v37, %v1034_v38 }
  0xcd   : > { %v1041_v42 = vadd.s32 %v358_v36, %v349_v10  ;;  %v474_v46 = vor.u32 %v473_v13, %v472_v41  ;;  %vm477_vm13 = vcmp.lt.s32.totalorder %v1014_v56, 3  ;;  %vm476_vm14 = vcmp.lt.s32.totalorder %v1014_v56, 2 }
  0xce   : > { %v484_v21 = vsel %vm478_vm11, %v471_v18, 920167782  ;;  %v385_v24 = vadd.s32 1, %v381_v44  ;;  %v487_v49 = vsel %vm475_vm10, %v1034_v38, %v468_v40  ;;  %v382_v50 = vmul.u32 %v987_v63, %v1010_v52 }
  0xcf   : > { %vm384_vm12 = vc.u32 %v1041_v42, %v1043_v43  ;;  %v485_v48 = vsel %vm477_vm13, %v468_v40, %v484_v21  ;;  %v488_v55 = vsel %vm478_vm11, %v474_v46, 1326507024  ;;  %v492_v57 = vand.u32 65535, %v1012_v53 }
  0xd0   : > { %v486_v54 = vsel %vm476_vm14, %v483_v47, %v485_v48  ;;  %v386_v58 = vsel %vm384_vm12, %v385_v24, %v381_v44  ;;  %v489_v60 = vsel %vm477_vm13, %v471_v18, %v488_v55  ;;  %v493_v63 = vshrl.u32 %v1012_v53, 16 }
  0xd1   : > { %v516_v62 = vand.u32 65535, %v486_v54  ;;  %v517_v0 = vshrl.u32 %v486_v54, 16  ;;  %v387_v2 = vadd.s32 %v386_v58, %v382_v50  ;;  %v490_v3 = vsel %vm476_vm14, %v487_v49, %v489_v60 }
  0xd2   : > { %v494_v52 = vand.u32 65535, %v490_v3  ;;  %v495_v4 = vshrl.u32 %v490_v3, 16  ;;  %v459_v33 = vshrl.u32 %v882_v9, %v1016_v16  ;;  %v480_v36 = vsel %vm478_vm11, %v468_v40, 2102212464 }
  0xd3   : > { %v519_v6 = vmul.u32 %v517_v0, %v492_v57  ;;  %v388_v8 = vadd.s32 536870912, %v387_v2  ;;  %v520_v10 = vmul.u32 %v516_v62, %v493_v63  ;;  %v518_v15 = vmul.u32 %v516_v62, %v492_v57 }
  0xd4   : > { %v497_v5 = vmul.u32 %v495_v4, %v492_v57  ;;  %v498_v12 = vmul.u32 %v494_v52, %v493_v63  ;;  %v496_v19 = vmul.u32 %v494_v52, %v492_v57  ;;  %v499_v20 = vmul.u32 %v495_v4, %v493_v63 }
  0xd5   : > { %v1074_v14 = vshrl.u32 %v388_v8, 30  ;;  %v522_v17 = vshll.u32 %v519_v6, 16  ;;  %v521_v23 = vmul.u32 %v517_v0, %v493_v63  ;;  %v524_v26 = vshll.u32 %v520_v10, 16 }
  0xd6   : > { %v500_v22 = vshll.u32 %v497_v5, 16  ;;  %v502_v25 = vshll.u32 %v498_v12, 16  ;;  %v501_v11 = vshrl.u32 %v497_v5, 16  ;;  %v479_v44 = vsel %vm475_vm10, %v459_v33, %v1032_v37 }
  0xd7   : > { %v390_v7 = vshll.u32 %v1074_v14, 30  ;;  %vm526_vm15 = vc.u32 %v518_v15, %v522_v17  ;;  %v528_v29 = vadd.s32 %v522_v17, %v518_v15  ;;  %v523_v9 = vshrl.u32 %v519_v6, 16 }
  0xd8   : > { %vm504_vm0 = vc.u32 %v496_v19, %v500_v22  ;;  %v506_v27 = vadd.s32 %v500_v22, %v496_v19  ;;  %v527_v28 = vsel %vm526_vm15, 1, %v877_v1  ;;  %v481_v47 = vsel %vm477_vm13, %v1034_v38, %v480_v36 }
  0xd9   : > { %v391_v30 = vsub.s32 %v387_v2, %v390_v7  ;;  %v505_v31 = vsel %vm504_vm0, 1, %v877_v1  ;;  %v529_v32 = vadd.s32 %v527_v28, %v521_v23  ;;  %vm530_vm2 = vc.u32 %v528_v29, %v524_v26 }
  0xda   : > { %v507_v34 = vadd.s32 %v505_v31, %v499_v20  ;;  %vm508_vm1 = vc.u32 %v506_v27, %v502_v25  ;;  %v531_v13 = vsel %vm530_vm2, 1, %v877_v1  ;;  %v503_v21 = vshrl.u32 %v498_v12, 16 }
  0xdb   : > { %vm392_vm3 = vcmp.lt.s32.totalorder %v391_v30, 0  ;;  %v393_v35 = vsub.s32 0, %v391_v30  ;;  %v509_v39 = vsel %vm508_vm1, 1, %v877_v1  ;;  %v533_v16 = vadd.s32 %v531_v13, %v529_v32 }
  0xdc   : > { %v511_v41 = vadd.s32 %v509_v39, %v507_v34  ;;  %v525_v24 = vshrl.u32 %v520_v10, 16  ;;  %v532_v54 = vadd.s32 %v528_v29, %v524_v26  ;;  %v482_v1 = vsel %vm476_vm14, %v479_v44, %v481_v47 }
  0xdd   : > { %v394_v18 = vsel %vm392_vm3, %v393_v35, %v391_v30  ;;  %v534_v48 = vadd.s32 %v533_v16, %v523_v9  ;;  %v383_v58 = vadd.s32 %v1043_v43, %v1041_v42  ;;  %v536_v62 = vmul.u32 %v1012_v53, %v482_v1 }
  0xde   : > { %v395_v46 = vclz %v394_v18  ;;  %v512_v40 = vadd.s32 %v511_v41, %v501_v11  ;;  %vm291_vm7 = vcmp.lt.s32.totalorder %v977_v45, 0  ;;  %vm1102_vm8 = vcmp.le.f32.partialorder %v289_v51, 0.7853982 }
  0xdf   : > { %v535_v55 = vadd.s32 %v534_v48, %v525_v24  ;;  %v413_v29 = vsub.s32 4, %v1074_v14  ;;  %vm445_vm12 = vcmp.lt.s32.totalorder %v983_v59, 0  ;;  %vm1123_vm14 = vcmp.le.f32.partialorder %v443_v61, 0.7853982 }
  0xe0   : > { %v705_v49 = vadd.s32 4294967294, %v395_v46  ;;  %v513_v50 = vadd.s32 %v512_v40, %v503_v21  ;;  %vm432_vm15 = vweird.f32 %v977_v45  ;;  %vm586_vm3 = vweird.f32 %v983_v59 }
  0xe1   : > { %v539_v57 = vadd.s32 1, %v535_v55  ;;  %v414_v39 = vsel %vm291_vm7, %v413_v29, %v1074_v14 }
  0xe2   : > { %vm706_vm4 = vcmp.lt.s32.totalorder %v705_v49, 0  ;;  %vm538_vm5 = vc.u32 %v513_v50, %v532_v54  ;;  %v537_v32 = vadd.s32 %v532_v54, %v513_v50  ;;  %v416_v46 = vsel %vm1102_vm8, 0, %v414_v39 }
  0xe3   : > { %v398_v37 = vsel %vm706_vm4, 0, %v705_v49  ;;  %v540_v0 = vsel %vm538_vm5, %v539_v57, %v535_v55  ;;  %v433_v49 = vand.u32 3, %v416_v46 }
  0xe4   : > { %v399_v60 = vsub.s32 32, %v398_v37  ;;  %v403_v38 = vsub.s32 4294967266, %v398_v37  ;;  %v400_v2 = vshll.u32 %v391_v30, %v398_v37  ;;  %v541_v52 = vadd.s32 %v540_v0, %v536_v62 }
  0xe5   : > { %vm435_vm10 = vcmp.eq.s32.totalorder %v433_v49, 0  ;;  %vm438_vm11 = vcmp.eq.s32.totalorder %v433_v49, 2  ;;  %vm434_vm13 = vcmp.lt.s32.totalorder %v433_v49, 2 }
  0xe6   : > { %v401_v3 = vshrl.u32 %v383_v58, %v399_v60  ;;  %v404_v63 = vadd.s32 127, %v403_v38  ;;  %v542_v6 = vadd.s32 536870912, %v541_v52 }
  0xe8   : > { %v402_v4 = vor.u32 %v401_v3, %v400_v2  ;;  %v405_v56 = vshll.u32 %v404_v63, 23  ;;  %v1096_v10 = vshrl.u32 %v542_v6, 30 }
  0xea   : > { %v406_v8 = vor.u32 4788187, %v405_v56  ;;  %v409_v12 = vcvt.s32.f32 %v402_v4  ;;  %v544_v15 = vshll.u32 %v1096_v10, 30  ;;  %v567_v4 = vsub.s32 4, %v1096_v10 }
  0xec   : > { %v407_v5 = vand.u32 2147483647, %v406_v8  ;;  %v545_v43 = vsub.s32 %v541_v52, %v544_v15 }
  0xee   : > { %v410_v42 = vmul.f32 %v409_v12, %v407_v5  ;;  %vm546_vm6 = vcmp.lt.s32.totalorder %v545_v43, 0  ;;  %v547_v53 = vsub.s32 0, %v545_v43  ;;  %v568_v5 = vsel %vm445_vm12, %v567_v4, %v1096_v10 }
  0xf0   : > { %v411_v17 = vxor.u32 2147483648, %v410_v42  ;;  %v548_v22 = vsel %vm546_vm6, %v547_v53, %v545_v43 }
  0xf1   : > { %v549_v7 = vclz %v548_v22 }
  0xf2   : > { %v412_v20 = vsel %vm291_vm7, %v411_v17, %v410_v42  ;;  %v570_v42 = vsel %vm1123_vm14, 0, %v568_v5 }
  0xf3   : > { %v415_v23 = vsel %vm1102_vm8, %v977_v45, %v412_v20  ;;  %v708_v26 = vadd.s32 4294967294, %v549_v7  ;;  %v587_v20 = vand.u32 3, %v570_v42 }
  0xf4   : > { %v417_v25 = vmul.f32 %v415_v23, %v415_v23 }
  0xf5   : > { %vm709_vm9 = vcmp.lt.s32.totalorder %v708_v26, 0  ;;  %vm589_vm0 = vcmp.eq.s32.totalorder %v587_v20, 0  ;;  %vm592_vm1 = vcmp.eq.s32.totalorder %v587_v20, 2  ;;  %vm588_vm2 = vcmp.lt.s32.totalorder %v587_v20, 2 }
  0xf6   : > { %v425_v27 = vmul.f32 -0.00019511016, %v417_v25  ;;  %v418_v28 = vmul.f32 -0.001358992, %v417_v25  ;;  %v552_v30 = vsel %vm709_vm9, 0, %v708_v26 }
  0xf7   : > { %v553_v33 = vsub.s32 32, %v552_v30  ;;  %v557_v34 = vsub.s32 4294967266, %v552_v30  ;;  %v554_v11 = vshll.u32 %v545_v43, %v552_v30 }
  0xf8   : > { %v426_v51 = vadd.f32 0.008332121, %v425_v27  ;;  %v419_v31 = vadd.f32 0.041655596, %v418_v28 }
  0xf9   : > { %v555_v41 = vshrl.u32 %v537_v32, %v553_v33  ;;  %v558_v13 = vadd.s32 127, %v557_v34 }
  0xfa   : > { %v427_v35 = vmul.f32 %v426_v51, %v417_v25  ;;  %v420_v36 = vmul.f32 %v419_v31, %v417_v25 }
  0xfb   : > { %v556_v9 = vor.u32 %v555_v41, %v554_v11  ;;  %v559_v16 = vshll.u32 %v558_v13, 23 }
  0xfc   : > { %v428_v18 = vadd.f32 -0.16666654, %v427_v35  ;;  %v421_v44 = vadd.f32 -0.4999988, %v420_v36 }
  0xfd   : > { %v560_v40 = vor.u32 4788187, %v559_v16  ;;  %v563_v14 = vcvt.s32.f32 %v556_v9 }
  0xfe   : > { %v429_v47 = vmul.f32 %v428_v18, %v417_v25  ;;  %v422_v21 = vmul.f32 %v421_v44, %v417_v25 }
  0xff   : > { %v561_v50 = vand.u32 2147483647, %v560_v40 }
 0x100   : > { %v430_v24 = vadd.f32 1.0, %v429_v47  ;;  %v423_v48 = vadd.f32 1.0, %v422_v21 }
 0x101   : > { %v564_v55 = vmul.f32 %v563_v14, %v561_v50 }
 0x102   : > { %v431_v54 = vmul.f32 %v430_v24, %v415_v23  ;;  %v439_v1 = vxor.u32 2147483648, %v423_v48 }
 0x103   : > { %v565_v57 = vxor.u32 2147483648, %v564_v55 }
 0x104   : > { %v436_v37 = vxor.u32 2147483648, %v431_v54  ;;  %v440_v60 = vsel %vm438_vm11, %v439_v1, %v431_v54 }
 0x105   : > { %v566_v62 = vsel %vm445_vm12, %v565_v57, %v564_v55 }
 0x106   : > { %v437_v58 = vsel %vm435_vm10, %v423_v48, %v436_v37  ;;  %v569_v2 = vsel %vm1123_vm14, %v983_v59, %v566_v62 }
 0x107   : > { %v441_v0 = vsel %vm434_vm13, %v437_v58, %v440_v60  ;;  %v571_v63 = vmul.f32 %v569_v2, %v569_v2 }
 0x108   : > { %v442_v3 = vsel %vm432_vm15, nan, %v441_v0 }
 0x109   : > { %597 = vst [vmem:[%s1133_s10] sm:$0xff] %v442_v3  ;;  %v579_v61 = vmul.f32 -0.00019511016, %v571_v63  ;;  %v572_v52 = vmul.f32 -0.001358992, %v571_v63 }
 0x10b   : > { %v580_v56 = vadd.f32 0.008332121, %v579_v61  ;;  %v573_v6 = vadd.f32 0.041655596, %v572_v52 }
 0x10d   : > { %v581_v45 = vmul.f32 %v580_v56, %v571_v63  ;;  %v574_v8 = vmul.f32 %v573_v6, %v571_v63 }
 0x10f   : > { %v582_v12 = vadd.f32 -0.16666654, %v581_v45  ;;  %v575_v15 = vadd.f32 -0.4999988, %v574_v8 }
 0x111   : > { %v583_v43 = vmul.f32 %v582_v12, %v571_v63  ;;  %v576_v17 = vmul.f32 %v575_v15, %v571_v63 }
 0x113   : > { %v584_v53 = vadd.f32 1.0, %v583_v43  ;;  %v577_v19 = vadd.f32 1.0, %v576_v17 }
 0x115   : > { %v585_v22 = vmul.f32 %v584_v53, %v569_v2  ;;  %v593_v23 = vxor.u32 2147483648, %v577_v19 }
 0x117   : > { %v590_v10 = vxor.u32 2147483648, %v585_v22  ;;  %v594_v25 = vsel %vm592_vm1, %v593_v23, %v585_v22 }
 0x119   : > { %v591_v7 = vsel %vm589_vm0, %v577_v19, %v590_v10 }
 0x11a   : > { %v595_v26 = vsel %vm588_vm2, %v591_v7, %v594_v25 }
 0x11b   : > { %v596_v27 = vsel %vm586_vm3, nan, %v595_v26 }
 0x11c   : > { %598 = vst [vmem:[%s1133_s10 + $0x8] sm:$0xff] %v596_v27 }
 0x11d   : > { %823 = shalt.err (!%p820_p5)
}
 0x11e   : > { %s888_s7 = smov 128   ;;  %s889_s8 = smov 8  }
 0x11f   : > { %717 = dma.vmem_to_hbm [thread:$0]  (%p950_p4), %s615_s23, 256, %s617_s26, %s600_s15, %s888_s7, %s888_s7, %s889_s8  }
 0x120 PF: > { %p723_p6 = scmp.ge.s32.totalorder %s874_s17, 2  ;;  %s631_s9 = sand.u32 1, %s854_s12  }
 0x121   : > { %s632_s10 = scalar_lea.sflag [#allocation3], %s631_s9 }
 0x122   : > { %p720_p7 = pnand %p723_p6, %p957_p8 }
 0x124   : > { %p721_p9 = pneg %p720_p7 }
 0x126   : > { %849 = dma.done.wait (%p721_p9), %s632_s10, 256  }
 0x127   : > { %851 = vsyncadd (%p721_p9), %s632_s10, 4294967040  ;;  %s16_s17 = sadd.s32 1, %s874_s17   ;;  %s1193_s12 = smov %s858_s13 }
 0x128   : > { %p13_p10 = scmp.ge.s32.totalorder %s16_s17, 4   ;;  %s1194_s13 = smov %s862_s14 }
 0x129   : > { %s1195_s14 = smov %s963_s25  ;;  %s1196_s15 = smov %s870_s16 }
 0x12a   : > { %s1197_s16 = smov %s1199_s20  ;;  %15 = sbr.rel (!%p13_p10) target bundleno = 4 (0x4), region = 67 }
 0x12f   :  { %638 = vsyncpa [#allocation3], 1 }
 0x130   :  { %640 = vsyncpa [#allocation3 + $0x1], 1 }

</bundles_post_ra>
